<compile_context>
chip_gen: v5e
topology: v5e:2x2
jax: 0.10.0
libtpu: 0.0.40
codegen_flags: <defaults>
</compile_context>

<pallas_src>
import functools

import jax
import jax.numpy as jnp
from jax.experimental import pallas as pl
from jax.experimental.pallas import tpu as pltpu

EPS = 1e-5  # InstanceNorm2d default eps


def _round_up(a, b):
    return ((a + b - 1) // b) * b


def _pick_halo_rows(ts, need):
    """Smallest multiple of 8 that divides `ts` and is >= `need` (ts itself qualifies)."""
    for cand in range(8, ts + 1, 8):
        if ts % cand == 0 and cand >= need:
            return cand
    return ts


def _make_block_kernel(n_ts, ts_rows, wpp, s_valid):
    """Build the fused conv(4 taps) + InstanceNorm + ReLU kernel."""
    offsets = (0, 1, wpp, wpp + 1)       # (dh, dw) tap -> row offset dh*Wpp + dw
    inv_s = 1.0 / float(s_valid)

    def kernel(xm_ref, xh_ref, w_ref, mask_ref, o_ref, s1_ref, s2_ref):
        # xm_ref:   (1, Ts, 4Cin) bf16  rows [ts*Ts, (ts+1)*Ts) of the flattened s2d input
        # xh_ref:   (1, Th, 4Cin) bf16  halo rows [(ts+1)*Ts, (ts+1)*Ts + Th)
        # w_ref:    (4, 4Cin, Cout) bf16  the 4 (dh, dw) tap weights
        # mask_ref: (Ts, 1) f32  1.0 on valid output rows, 0.0 on garbage/padded rows
        # o_ref:    (1, Sp_pad, Cout) f32  VMEM-resident per image (Cout on lanes)
        # s1_ref/s2_ref: (1, Cout) f32 scratch — carried per-channel sum / sum-of-squares
        ts = pl.program_id(1)

        @pl.when(ts == 0)
        def _init():
            s1_ref[...] = jnp.zeros_like(s1_ref)
            s2_ref[...] = jnp.zeros_like(s2_ref)

        xm = xm_ref[0]                    # (Ts, 4Cin)
        xh = xh_ref[0]                    # (Th, 4Cin)

        # 4 grouped taps of the space-to-depth'd 2x2/stride-1 conv: K = 4*Cin each,
        # f32 accumulation on the MXU.
        acc = jnp.dot(xm, w_ref[0], preferred_element_type=jnp.float32)
        for t in range(1, 4):
            off = offsets[t]
            if off == ts_rows:
                xt = xh[:ts_rows, :]
            else:
                xt = jnp.concatenate([xm[off:, :], xh[:off, :]], axis=0)
            acc = acc + jnp.dot(xt, w_ref[t], preferred_element_type=jnp.float32)

        # Carried InstanceNorm statistics (mask zeroes the garbage column / padded rows).
        msk = mask_ref[...]                              # (Ts, 1)
        am = acc * msk
        s1_ref[...] += jnp.sum(am, axis=0, keepdims=True)
        s2_ref[...] += jnp.sum(am * acc, axis=0, keepdims=True)

        # Un-normalized rows into the resident output block (fixed up at the last tile).
        start = pl.multiple_of(ts * ts_rows, 8)
        o_ref[0, pl.ds(start, ts_rows), :] = acc

        @pl.when(ts == n_ts - 1)
        def _finalize():
            mean = s1_ref[...] * inv_s                   # (1, Cout)
            var = jnp.maximum(s2_ref[...] * inv_s - mean * mean, 0.0)  # clamp f32 cancellation
            inv = jax.lax.rsqrt(var + EPS)
            # Normalize + ReLU the whole resident output in place, chunk by chunk
            # (static unroll; avoids a full-size f32 temporary).
            for c in range(n_ts):
                blk = o_ref[0, pl.ds(c * ts_rows, ts_rows), :]
                o_ref[0, pl.ds(c * ts_rows, ts_rows), :] = jnp.maximum(
                    (blk - mean) * inv, 0.0)

    return kernel


@functools.partial(jax.jit, static_argnames=("tile_rows",))
def block_forward(x_nchw, w_hwio, tile_rows=2048):
    """x_nchw: (N, Cin, H, W) float32; w_hwio: (4, 4, Cin, Cout).
    Returns (N, Cout, H/2, W/2) float32 — Conv4x4/s2(reflect pad 1) -> InstanceNorm -> ReLU."""
    N, Cin, H, W = x_nchw.shape
    KH, KW, Cin_w, Cout = w_hwio.shape
    assert Cin == Cin_w and KH == 4 and KW == 4
    assert H % 2 == 0 and W % 2 == 0

    Ho, Wo = H // 2, W // 2
    Hpp, Wpp = Ho + 1, Wo + 1            # space-to-depth grid of the reflect-padded input
    K4 = 4 * Cin
    S = Ho * Wo                          # valid spatial size (InstanceNorm denominator)
    Sp = Ho * Wpp                        # flattened output grid (1 garbage column per row)
    Spp = Hpp * Wpp                      # flattened s2d input grid

    # --- spatial (row) tiling ----------------------------------------------------
    Ts = min(_round_up(max(tile_rows, 8), 8), _round_up(Sp, 8))
    Ts = max(Ts, _round_up(Wpp + 2, 8))  # a tile must be able to host a full halo shift
    n_ts = pl.cdiv(Sp, Ts)
    Th = _pick_halo_rows(Ts, Wpp + 1)    # halo rows needed for tap offsets up to Wpp+1
    Sp_pad = n_ts * Ts
    in_rows = (n_ts + 1) * Ts            # main tiles + zero padding covering every halo

    # --- wrapper glue: layout only, no FLOPs --------------------------------------
    xb = x_nchw.astype(jnp.bfloat16)     # cast BEFORE padding/reshapes (halves glue traffic)
    x_pad = jnp.pad(xb, ((0, 0), (0, 0), (1, 1), (1, 1)), mode="reflect")
    # Space-to-depth by 2: x_pad[n, c, 2*i2+p, 2*j2+q] -> z[n, i2, j2, p, q, c]
    z = x_pad.reshape(N, Cin, Hpp, 2, Wpp, 2)
    z = jnp.transpose(z, (0, 2, 4, 3, 5, 1))           # (N, Hpp, Wpp, p, q, Cin)
    x_flat = z.reshape(N, Spp, K4)                     # channels-last, spatial flattened
    x_flat = jnp.pad(x_flat, ((0, 0), (0, in_rows - Spp), (0, 0)))

    # Conv weight regrouped into the 4 (dh, dw) taps of the 2x2 conv: (4, 4*Cin, Cout)
    w2 = w_hwio.reshape(2, 2, 2, 2, Cin, Cout)         # (dh, p, dw, q, Cin, Cout)
    w2 = jnp.transpose(w2, (0, 2, 1, 3, 4, 5)).reshape(4, K4, Cout).astype(jnp.bfloat16)

    # Validity mask over the flattened output grid (0 on garbage column / padded rows).
    p_idx = jnp.arange(Sp_pad, dtype=jnp.int32)
    mask = ((p_idx < Sp) & (p_idx % Wpp < Wo)).astype(jnp.float32)[:, None]   # (Sp_pad, 1)

    kernel = _make_block_kernel(n_ts, Ts, Wpp, S)
    halo_blocks_per_tile = Ts // Th                    # Th divides Ts by construction

    cost = pl.CostEstimate(
        flops=2 * N * S * (KH * KW * Cin) * Cout,
        transcendentals=N * Cout,                      # rsqrt
        bytes_accessed=(N * in_rows * K4 * 2           # s2d input (+ halo re-reads)
                        + 4 * K4 * Cout * 2
                        + N * Sp_pad * Cout * 4),
    )

    out_flat = pl.pallas_call(
        kernel,
        out_shape=jax.ShapeDtypeStruct((N, Sp_pad, Cout), jnp.float32),
        grid=(N, n_ts),
        in_specs=[
            # main row tile of the flattened s2d input
            pl.BlockSpec((1, Ts, K4), lambda n, t: (n, t, 0)),
            # halo rows = first Th rows of the NEXT tile (same array passed twice)
            pl.BlockSpec((1, Th, K4),
                         lambda n, t, b=halo_blocks_per_tile: (n, (t + 1) * b, 0)),
            # tap weights (constant block)
            pl.BlockSpec((4, K4, Cout), lambda n, t: (0, 0, 0)),
            # validity mask tile
            pl.BlockSpec((Ts, 1), lambda n, t: (t, 0)),
        ],
        # Output block is full per image (index ignores t) -> stays resident in VMEM
        # across the ts loop so the last step can normalize + ReLU it in place.
        out_specs=pl.BlockSpec((1, Sp_pad, Cout), lambda n, t: (n, 0, 0)),
        scratch_shapes=[pltpu.VMEM((1, Cout), jnp.float32),    # sum
                        pltpu.VMEM((1, Cout), jnp.float32)],   # sum of squares
        compiler_params=pltpu.CompilerParams(
            dimension_semantics=("parallel", "arbitrary"),     # N parallel, ts carried
            vmem_limit_bytes=48 * 1024 * 1024,                 # headroom below v7x's 64 MiB
        ),
        cost_estimate=cost,
    )(x_flat, x_flat, w2, mask)

    # Drop the garbage column / padded rows, restore NCHW (layout-only).
    out = out_flat[:, :Sp, :].reshape(N, Ho, Wpp, Cout)[:, :, :Wo, :]
    return jnp.transpose(out, (0, 3, 1, 2))


def block_reference(x_nchw, w_hwio):
    """Pure-JAX f32 reference of the same forward pass for validation."""
    x = jnp.transpose(x_nchw, (0, 2, 3, 1))
    x_pad = jnp.pad(x, ((0, 0), (1, 1), (1, 1), (0, 0)), mode="reflect")
    y = jax.lax.conv_general_dilated(
        x_pad, w_hwio, window_strides=(2, 2), padding="VALID",
        dimension_numbers=("NHWC", "HWIO", "NHWC"))
    mean = jnp.mean(y, axis=(1, 2), keepdims=True)
    var = jnp.mean((y - mean) ** 2, axis=(1, 2), keepdims=True)
    y = (y - mean) * jax.lax.rsqrt(var + EPS)
    y = jnp.maximum(y, 0.0)
    return jnp.transpose(y, (0, 3, 1, 2))


def _run_case(key, n, cin, hw, cout, tile_rows):
    kx, kw = jax.random.split(key)
    x = jax.random.normal(kx, (n, cin, hw, hw), dtype=jnp.float32)
    w = jax.random.normal(kw, (4, 4, cin, cout), dtype=jnp.float32) / jnp.sqrt(16.0 * cin)
    out = jax.block_until_ready(block_forward(x, w, tile_rows=tile_rows))
    ref = jax.block_until_ready(block_reference(x, w))
    assert out.shape == (n, cout, hw // 2, hw // 2), out.shape
    # bf16 matmul inputs (f32 accumulation) -> tolerance loosened vs. the f32 reference.
    err = float(jnp.max(jnp.abs(out - ref)))
    assert jnp.allclose(out, ref, atol=3e-2, rtol=3e-2), err


if __name__ == "__main__":
    key = jax.random.PRNGKey(0)
    k1, k2, k3 = jax.random.split(key, 3)
    # Single-tile path.
    _run_case(k1, n=2, cin=4, hw=16, cout=8, tile_rows=2048)
    # Multi-tile path (forces 3 spatial tiles -> exercises halo + carried stats + final pass).
    _run_case(k2, n=2, cin=4, hw=16, cout=8, tile_rows=32)
    # Slightly larger shape, also multi-tile.
    _run_case(k3, n=1, cin=8, hw=32, cout=16, tile_rows=128)
    print("KERNEL_OK")
</pallas_src>

<mosaic_0001>
module attributes {stable_mosaic.version = 11 : i64} {
  func.func @kernel(%arg0: i32, %arg1: i32, %arg2: memref<1x72x16xbf16, #tpu.memory_space<vmem>>, %arg3: memref<1x24x16xbf16, #tpu.memory_space<vmem>>, %arg4: memref<4x16x8xbf16, #tpu.memory_space<vmem>>, %arg5: memref<72x1xf32, #tpu.memory_space<vmem>>, %arg6: memref<1x72x8xf32, #tpu.memory_space<vmem>>, %arg7: memref<1x8xf32, #tpu.memory_space<vmem>>, %arg8: memref<1x8xf32, #tpu.memory_space<vmem>>) attributes {dimension_semantics = [#tpu.dimension_semantics<parallel>, #tpu.dimension_semantics<arbitrary>], iteration_bounds = array<i64: 2, 1>, scalar_prefetch = 0 : i64, scratch_operands = 2 : i64, tpu.core_type = #tpu.core_type<tc>, window_params = [{transform_indices = @transform_0, window_bounds = array<i64: 1, 72, 16>}, {transform_indices = @transform_1, window_bounds = array<i64: 1, 24, 16>}, {pipeline_mode = #tpu.pipeline_mode<synchronous>, transform_indices = @transform_2, window_bounds = array<i64: 4, 16, 8>}, {transform_indices = @transform_3, window_bounds = array<i64: 72, 1>}, {transform_indices = @transform_4, window_bounds = array<i64: 1, 72, 8>}]} {
    %c0_i32 = arith.constant 0 : i32
    %0 = arith.cmpi eq, %arg1, %c0_i32 : i32
    %1 = arith.extui %0 : i1 to i32
    %c0_i32_0 = arith.constant 0 : i32
    %2 = arith.cmpi ne, %1, %c0_i32_0 : i32
    scf.if %2 {
      %cst_34 = arith.constant 0.000000e+00 : f32
      %54 = vector.broadcast %cst_34 : f32 to vector<1x8xf32>
      %c0_35 = arith.constant 0 : index
      %c0_36 = arith.constant 0 : index
      %55 = vector.load %arg7[%c0_35, %c0_36] : memref<1x8xf32, #tpu.memory_space<vmem>>, vector<1x8xf32>
      tpu.vector_store %arg7[%c0_35, %c0_36], %54 {strides = array<i32>} : memref<1x8xf32, #tpu.memory_space<vmem>>, vector<1x8xf32>,
      %cst_37 = arith.constant 0.000000e+00 : f32
      %56 = vector.broadcast %cst_37 : f32 to vector<1x8xf32>
      %c0_38 = arith.constant 0 : index
      %c0_39 = arith.constant 0 : index
      %57 = vector.load %arg8[%c0_38, %c0_39] : memref<1x8xf32, #tpu.memory_space<vmem>>, vector<1x8xf32>
      tpu.vector_store %arg8[%c0_38, %c0_39], %56 {strides = array<i32>} : memref<1x8xf32, #tpu.memory_space<vmem>>, vector<1x8xf32>,
    } else {
    }
    %c0 = arith.constant 0 : index
    %c0_1 = arith.constant 0 : index
    %c0_2 = arith.constant 0 : index
    %3 = vector.load %arg2[%c0, %c0_1, %c0_2] : memref<1x72x16xbf16, #tpu.memory_space<vmem>>, vector<1x72x16xbf16>
    %4 = vector.shape_cast %3 : vector<1x72x16xbf16> to vector<72x16xbf16>
    %c0_3 = arith.constant 0 : index
    %c0_4 = arith.constant 0 : index
    %c0_5 = arith.constant 0 : index
    %5 = vector.load %arg3[%c0_3, %c0_4, %c0_5] : memref<1x24x16xbf16, #tpu.memory_space<vmem>>, vector<1x24x16xbf16>
    %6 = vector.shape_cast %5 : vector<1x24x16xbf16> to vector<24x16xbf16>
    %c0_6 = arith.constant 0 : index
    %c0_7 = arith.constant 0 : index
    %c0_8 = arith.constant 0 : index
    %7 = vector.load %arg4[%c0_6, %c0_7, %c0_8] : memref<4x16x8xbf16, #tpu.memory_space<vmem>>, vector<1x16x8xbf16>
    %8 = vector.shape_cast %7 : vector<1x16x8xbf16> to vector<16x8xbf16>
    %cst = arith.constant dense<0.000000e+00> : vector<72x8xf32>
    %9 = tpu.matmul %4, %8, %cst {dimension_numbers = #tpu.dot_dimension_numbers<[1], [0], [0], [1], [0, 0, 1, 1], [], []>} : vector<72x16xbf16>, vector<16x8xbf16>, vector<72x8xf32> -> vector<72x8xf32>
    %10 = vector.extract_strided_slice %4 {offsets = [1, 0], sizes = [71, 16], strides = [1, 1]} : vector<72x16xbf16> to vector<71x16xbf16>
    %11 = vector.extract_strided_slice %6 {offsets = [0, 0], sizes = [1, 16], strides = [1, 1]} : vector<24x16xbf16> to vector<1x16xbf16>
    %12 = tpu.concatenate %10, %11 in 0 : vector<71x16xbf16>, vector<1x16xbf16> -> vector<72x16xbf16>
    %c1 = arith.constant 1 : index
    %c0_9 = arith.constant 0 : index
    %c0_10 = arith.constant 0 : index
    %13 = vector.load %arg4[%c1, %c0_9, %c0_10] : memref<4x16x8xbf16, #tpu.memory_space<vmem>>, vector<1x16x8xbf16>
    %14 = vector.shape_cast %13 : vector<1x16x8xbf16> to vector<16x8xbf16>
    %cst_11 = arith.constant dense<0.000000e+00> : vector<72x8xf32>
    %15 = tpu.matmul %12, %14, %cst_11 {dimension_numbers = #tpu.dot_dimension_numbers<[1], [0], [0], [1], [0, 0, 1, 1], [], []>} : vector<72x16xbf16>, vector<16x8xbf16>, vector<72x8xf32> -> vector<72x8xf32>
    %16 = arith.addf %9, %15 : vector<72x8xf32>
    %17 = vector.extract_strided_slice %4 {offsets = [9, 0], sizes = [63, 16], strides = [1, 1]} : vector<72x16xbf16> to vector<63x16xbf16>
    %18 = vector.extract_strided_slice %6 {offsets = [0, 0], sizes = [9, 16], strides = [1, 1]} : vector<24x16xbf16> to vector<9x16xbf16>
    %19 = tpu.concatenate %17, %18 in 0 : vector<63x16xbf16>, vector<9x16xbf16> -> vector<72x16xbf16>
    %c2 = arith.constant 2 : index
    %c0_12 = arith.constant 0 : index
    %c0_13 = arith.constant 0 : index
    %20 = vector.load %arg4[%c2, %c0_12, %c0_13] : memref<4x16x8xbf16, #tpu.memory_space<vmem>>, vector<1x16x8xbf16>
    %21 = vector.shape_cast %20 : vector<1x16x8xbf16> to vector<16x8xbf16>
    %cst_14 = arith.constant dense<0.000000e+00> : vector<72x8xf32>
    %22 = tpu.matmul %19, %21, %cst_14 {dimension_numbers = #tpu.dot_dimension_numbers<[1], [0], [0], [1], [0, 0, 1, 1], [], []>} : vector<72x16xbf16>, vector<16x8xbf16>, vector<72x8xf32> -> vector<72x8xf32>
    %23 = arith.addf %16, %22 : vector<72x8xf32>
    %24 = vector.extract_strided_slice %4 {offsets = [10, 0], sizes = [62, 16], strides = [1, 1]} : vector<72x16xbf16> to vector<62x16xbf16>
    %25 = vector.extract_strided_slice %6 {offsets = [0, 0], sizes = [10, 16], strides = [1, 1]} : vector<24x16xbf16> to vector<10x16xbf16>
    %26 = tpu.concatenate %24, %25 in 0 : vector<62x16xbf16>, vector<10x16xbf16> -> vector<72x16xbf16>
    %c3 = arith.constant 3 : index
    %c0_15 = arith.constant 0 : index
    %c0_16 = arith.constant 0 : index
    %27 = vector.load %arg4[%c3, %c0_15, %c0_16] : memref<4x16x8xbf16, #tpu.memory_space<vmem>>, vector<1x16x8xbf16>
    %28 = vector.shape_cast %27 : vector<1x16x8xbf16> to vector<16x8xbf16>
    %cst_17 = arith.constant dense<0.000000e+00> : vector<72x8xf32>
    %29 = tpu.matmul %26, %28, %cst_17 {dimension_numbers = #tpu.dot_dimension_numbers<[1], [0], [0], [1], [0, 0, 1, 1], [], []>} : vector<72x16xbf16>, vector<16x8xbf16>, vector<72x8xf32> -> vector<72x8xf32>
    %30 = arith.addf %23, %29 : vector<72x8xf32>
    %c0_18 = arith.constant 0 : index
    %c0_19 = arith.constant 0 : index
    %31 = vector.load %arg5[%c0_18, %c0_19] : memref<72x1xf32, #tpu.memory_space<vmem>>, vector<72x1xf32>
    %32 = vector.broadcast %31 : vector<72x1xf32> to vector<72x8xf32>
    %33 = arith.mulf %30, %32 : vector<72x8xf32>
    %c0_20 = arith.constant 0 : index
    %c0_21 = arith.constant 0 : index
    %34 = vector.load %arg7[%c0_20, %c0_21] : memref<1x8xf32, #tpu.memory_space<vmem>>, vector<1x8xf32>
    %cst_22 = arith.constant dense<0.000000e+00> : vector<8xf32>
    %35 = vector.multi_reduction <add>, %33, %cst_22 [0] : vector<72x8xf32> to vector<8xf32>
    %36 = vector.shape_cast %35 : vector<8xf32> to vector<1x8xf32>
    %37 = arith.addf %34, %36 : vector<1x8xf32>
    %c0_23 = arith.constant 0 : index
    %c0_24 = arith.constant 0 : index
    %38 = vector.load %arg7[%c0_23, %c0_24] : memref<1x8xf32, #tpu.memory_space<vmem>>, vector<1x8xf32>
    tpu.vector_store %arg7[%c0_23, %c0_24], %37 {strides = array<i32>} : memref<1x8xf32, #tpu.memory_space<vmem>>, vector<1x8xf32>,
    %c0_25 = arith.constant 0 : index
    %c0_26 = arith.constant 0 : index
    %39 = vector.load %arg8[%c0_25, %c0_26] : memref<1x8xf32, #tpu.memory_space<vmem>>, vector<1x8xf32>
    %40 = arith.mulf %33, %30 : vector<72x8xf32>
    %cst_27 = arith.constant dense<0.000000e+00> : vector<8xf32>
    %41 = vector.multi_reduction <add>, %40, %cst_27 [0] : vector<72x8xf32> to vector<8xf32>
    %42 = vector.shape_cast %41 : vector<8xf32> to vector<1x8xf32>
    %43 = arith.addf %39, %42 : vector<1x8xf32>
    %c0_28 = arith.constant 0 : index
    %c0_29 = arith.constant 0 : index
    %44 = vector.load %arg8[%c0_28, %c0_29] : memref<1x8xf32, #tpu.memory_space<vmem>>, vector<1x8xf32>
    tpu.vector_store %arg8[%c0_28, %c0_29], %43 {strides = array<i32>} : memref<1x8xf32, #tpu.memory_space<vmem>>, vector<1x8xf32>,
    %c72_i32 = arith.constant 72 : i32
    %45 = arith.muli %arg1, %c72_i32 : i32
    %46 = tpu.assume_multiple %45, 8 : i32
    %c0_30 = arith.constant 0 : index
    %47 = arith.index_cast %46 : i32 to index
    %c0_31 = arith.constant 0 : index
    %48 = vector.load %arg6[%c0_30, %47, %c0_31] : memref<1x72x8xf32, #tpu.memory_space<vmem>>, vector<1x72x8xf32>
    %49 = vector.shape_cast %48 : vector<1x72x8xf32> to vector<72x8xf32>
    %50 = vector.shape_cast %30 : vector<72x8xf32> to vector<1x72x8xf32>
    tpu.vector_store %arg6[%c0_30, %47, %c0_31], %50 {strides = array<i32>} : memref<1x72x8xf32, #tpu.memory_space<vmem>>, vector<1x72x8xf32>,
    %c0_i32_32 = arith.constant 0 : i32
    %51 = arith.cmpi eq, %arg1, %c0_i32_32 : i32
    %52 = arith.extui %51 : i1 to i32
    %c0_i32_33 = arith.constant 0 : i32
    %53 = arith.cmpi ne, %52, %c0_i32_33 : i32
    scf.if %53 {
      %c0_34 = arith.constant 0 : index
      %c0_35 = arith.constant 0 : index
      %54 = vector.load %arg7[%c0_34, %c0_35] : memref<1x8xf32, #tpu.memory_space<vmem>>, vector<1x8xf32>
      %cst_36 = arith.constant 1.562500e-02 : f32
      %55 = vector.broadcast %cst_36 : f32 to vector<1x8xf32>
      %56 = arith.mulf %54, %55 : vector<1x8xf32>
      %c0_37 = arith.constant 0 : index
      %c0_38 = arith.constant 0 : index
      %57 = vector.load %arg8[%c0_37, %c0_38] : memref<1x8xf32, #tpu.memory_space<vmem>>, vector<1x8xf32>
      %cst_39 = arith.constant 1.562500e-02 : f32
      %58 = vector.broadcast %cst_39 : f32 to vector<1x8xf32>
      %59 = arith.mulf %57, %58 : vector<1x8xf32>
      %60 = arith.mulf %56, %56 : vector<1x8xf32>
      %61 = arith.subf %59, %60 : vector<1x8xf32>
      %cst_40 = arith.constant 0.000000e+00 : f32
      %62 = vector.broadcast %cst_40 : f32 to vector<1x8xf32>
      %63 = arith.maximumf %61, %62 : vector<1x8xf32>
      %cst_41 = arith.constant 9.99999974E-6 : f32
      %64 = vector.broadcast %cst_41 : f32 to vector<1x8xf32>
      %65 = arith.addf %63, %64 : vector<1x8xf32>
      %66 = math.rsqrt %65 : vector<1x8xf32>
      %c0_42 = arith.constant 0 : index
      %c0_43 = arith.constant 0 : index
      %c0_44 = arith.constant 0 : index
      %67 = vector.load %arg6[%c0_42, %c0_43, %c0_44] : memref<1x72x8xf32, #tpu.memory_space<vmem>>, vector<1x72x8xf32>
      %68 = vector.shape_cast %67 : vector<1x72x8xf32> to vector<72x8xf32>
      %69 = vector.broadcast %56 : vector<1x8xf32> to vector<72x8xf32>
      %70 = arith.subf %68, %69 : vector<72x8xf32>
      %71 = vector.broadcast %66 : vector<1x8xf32> to vector<72x8xf32>
      %72 = arith.mulf %70, %71 : vector<72x8xf32>
      %cst_45 = arith.constant 0.000000e+00 : f32
      %73 = vector.broadcast %cst_45 : f32 to vector<72x8xf32>
      %74 = arith.maximumf %72, %73 : vector<72x8xf32>
      %c0_46 = arith.constant 0 : index
      %c0_47 = arith.constant 0 : index
      %c0_48 = arith.constant 0 : index
      %75 = vector.load %arg6[%c0_46, %c0_47, %c0_48] : memref<1x72x8xf32, #tpu.memory_space<vmem>>, vector<1x72x8xf32>
      %76 = vector.shape_cast %75 : vector<1x72x8xf32> to vector<72x8xf32>
      %77 = vector.shape_cast %74 : vector<72x8xf32> to vector<1x72x8xf32>
      tpu.vector_store %arg6[%c0_46, %c0_47, %c0_48], %77 {strides = array<i32>} : memref<1x72x8xf32, #tpu.memory_space<vmem>>, vector<1x72x8xf32>,
    } else {
    }
    return
  }
  func.func @transform_0(%arg0: i32, %arg1: i32) -> (i32, i32, i32) {
    %c0_i32 = arith.constant 0 : i32
    %c0_i32_0 = arith.constant 0 : i32
    return %arg0, %arg1, %c0_i32 : i32, i32, i32
  }
  func.func @transform_1(%arg0: i32, %arg1: i32) -> (i32, i32, i32) {
    %c1_i32 = arith.constant 1 : i32
    %0 = arith.addi %arg1, %c1_i32 : i32
    %c3_i32 = arith.constant 3 : i32
    %1 = arith.muli %0, %c3_i32 : i32
    %c0_i32 = arith.constant 0 : i32
    %c0_i32_0 = arith.constant 0 : i32
    return %arg0, %1, %c0_i32 : i32, i32, i32
  }
  func.func @transform_2(%arg0: i32, %arg1: i32) -> (i32, i32, i32) {
    %c0_i32 = arith.constant 0 : i32
    %c0_i32_0 = arith.constant 0 : i32
    %c0_i32_1 = arith.constant 0 : i32
    %c0_i32_2 = arith.constant 0 : i32
    return %c0_i32, %c0_i32_0, %c0_i32_1 : i32, i32, i32
  }
  func.func @transform_3(%arg0: i32, %arg1: i32) -> (i32, i32) {
    %c0_i32 = arith.constant 0 : i32
    %c0_i32_0 = arith.constant 0 : i32
    return %arg1, %c0_i32 : i32, i32
  }
  func.func @transform_4(%arg0: i32, %arg1: i32) -> (i32, i32, i32) {
    %c0_i32 = arith.constant 0 : i32
    %c0_i32_0 = arith.constant 0 : i32
    %c0_i32_1 = arith.constant 0 : i32
    return %arg0, %c0_i32, %c0_i32_0 : i32, i32, i32
  }
}

</mosaic_0001>

<bundles_post_ra>
// kernel: block_forward.1
= control target key start
LH: loop header
LB: loop body
LE: loop exit
PB: predicated region body
PF: predicated region fallthrough
CT: control target
= control target key end

     0   :  { %s1197_s15 = smov 0   ;;  %s1199_s16 = smov 0   ;;  %s1393_s0 = inlined_call_operand.vmem [shape: bf16[2,144,16], index: 0, kind: input, shape index: {}, may-alias: {0,1}]   ;;  %s1394_s1 = inlined_call_operand.vmem [shape: bf16[2,144,16], index: 1, kind: input, shape index: {}, may-alias: {0,1}]   ;;  %s1395_s2 = inlined_call_operand.vmem [shape: bf16[4,16,8], index: 2, kind: input, shape index: {}]   ;;  %s1396_s3 = inlined_call_operand.vmem [shape: f32[72,1], index: 3, kind: input, shape index: {}]   ;;  %s1397_s4 = inlined_call_operand.vmem [shape: f32[2,72,8], index: 4, kind: output, shape index: {}]  }
   0x1   :  { %s1201_s17 = smov 0  }
   0x2 LB: > { %s26_s18 = sadd.s32 1, %s1164_s16  ;;  %p1014_p0 = scmp.ge.s32.totalorder %s1168_s17, 1  ;;  %s1168_s17 = sphi %s1201_s17, %s14_s17   ;;  %s1164_s16 = sphi %s1199_s16, %s1399_s16   ;;  %s1160_s15 = sphi %s1197_s15, %s1398_s15  }
   0x3   : > { %p28_p1 = scmp.ge.s32.totalorder %s26_s18, 2  ;;  %p217_p2 = scmp.lt.s32.totalorder %s1168_s17, 3 }
   0x5   : > { %s1401_s18 = smov (%p28_p1, %s26_s18), 0  ;;  %p218_p3 = pnand %p1014_p0, %p217_p2 }
   0x6   : > { %p264_p4 = scmp.lt.s32.totalorder (!%p218_p3), %s1160_s15, 1 }
   0x7   : > { %221 = sbr.rel (%p218_p3) target bundleno = 295 (0x127), region = 36 }
   0xc   : > { %v1064_v0 = vld [vmem:[%s1395_s2] sm:$0xff]  ;;  %v1067_v1 = vld [vmem:[%s1395_s2 + $0x18] sm:$0xff]  ;;  %v1065_v2 = vld [vmem:[%s1395_s2 + $0x8] sm:$0xff]  ;;  %s1403_s15 = smov (!%p264_p4, %s1160_s15), 1  ;;  %v1170_v5 = vmov 0   ;;  %vm404_vm0 = vcmask 130048  }
   0xd   : > { %v1066_v3 = vld [vmem:[%s1395_s2 + $0x10] sm:$0xff]  ;;  %476 = vmatpush.bf16.msra.mxu1 %v1064_v0  ;;  %660 = vmatpush.bf16.msra.mxu3 %v1067_v1  ;;  %v695_v4 = vld [vmem:[%s1396_s3] sm:$0xff]  ;;  %s1230_s29 = smul.u32 72, %s1403_s15  ;;  %vm618_vm1 = vcmask 1046528   ;;  %vm342_vm2 = vsmask.f32 7424 }
   0xe   : > { %427 = vmatpush.bf16.msra.mxu0 %v1065_v2  ;;  %583 = vmatpush.bf16.msra.mxu2 %v1066_v3  ;;  %v696_v24 = vld [vmem:[%s1396_s3 + $0x8] sm:$0xff]  ;;  %v697_v30 = vld [vmem:[%s1396_s3 + $0x10] sm:$0xff]  ;;  %v698_v44 = vld [vmem:[%s1396_s3 + $0x18] sm:$0xff]  ;;  %vm549_vm3 = vcmask 1047552   ;;  %vm391_vm5 = vcmask 1043456   ;;  %vm759_vm8 = vcmask 64512  }
   0xf   : > { %1141 = vset.pattern.permute.xlu0 %v1170_v5  ;;  %1142 = vset.pattern.permute.xlu1 %v1170_v5  ;;  %s1236_s6 = scalar_lea.vmem %s1393_s0, %s1230_s29  ;;  %s1063_s13 = sadd.s32 36, %s1230_s29  ;;  %v701_v61 = vld [vmem:[%s1396_s3 + $0x30] sm:$0xff]  ;;  %v702_v63 = vld [vmem:[%s1396_s3 + $0x38] sm:$0xff]  ;;  %v699_v0 = vld [vmem:[%s1396_s3 + $0x20] sm:$0xff]  ;;  %vm392_vm6 = vsmask.f32 3328 }
  0x10   : > { %706 = vperm.xlu0 %1141, %v695_v4   ;;  %1143 = vset.pattern.permute.xlu2 %v1170_v5  ;;  %v1069_v6 = vld [vmem:[%s1236_s6] sm:$0xff]   ;;  %v1110_v8 = vld [vmem:[%s1236_s6 + $0xc] sm:$0xff]   ;;  %v1111_v28 = vld [vmem:[%s1236_s6 + $0x14] sm:$0xff]   ;;  %s283_s19 = scalar_lea.vmem %s1394_s1, %s1063_s13  ;;  %s1310_s7 = scalar_lea.vmem %s1397_s4, %s1230_s29  ;;  %vm303_vm9 = vcmask 57344  }
  0x11   : > { %v1108_v7 = vld [vmem:[%s1236_s6 + $0x4] sm:$0xff]   ;;  %v344_v9 = vshrl.u32 %v1069_v6, 16  ;;  %v346_v10 = vshll.u32 %v1069_v6, 16  ;;  %1033 = vmatmul.msk.bf16.vlgmr.msra.gmra.mxu1 %vm404_vm0, %v1069_v6  ;;  %v620_v13 = vrot.slane %v1110_v8, 1  ;;  %v514_v18 = vshll.u32 %v1110_v8, 16  ;;  %v1089_v29 = vld [vmem:[%s1236_s6 + $0x10] sm:$0xff]   ;;  %716 = vperm.xlu1 %1142, %v697_v30   ;;  %vm550_vm4 = vmand %vm549_vm3, %vm342_vm2 }
  0x12   : > { %v1088_v11 = vld [vmem:[%s1236_s6 + $0x8] sm:$0xff]   ;;  %v619_v12 = vrot.slane %v1108_v7, 1  ;;  %v507_v16 = vshrl.u32 %v1108_v7, 16  ;;  %v509_v17 = vshll.u32 %v1108_v7, 16  ;;  %v359_v32 = vshll.u32 %v1089_v29, 16  ;;  %v1090_v41 = vld [vmem:[%s1236_s6 + $0x18] sm:$0xff]   ;;  %726 = vperm.xlu2 %1143, %v699_v0   ;;  %vm393_vm7 = vmand %vm391_vm5, %vm392_vm6 }
  0x13   : > { %v351_v14 = vshll.u32 %v1088_v11, 16  ;;  %v348_v15 = vrot.slane %v346_v10, 1  ;;  %v516_v23 = vrot.slane %v514_v18, 1  ;;  %v355_v31 = vshrl.u32 %v1088_v11, 16  ;;  %v314_v42 = vld [vmem:[%s1236_s6 + $0x20] sm:$0xf] }
  0x14   : > { %v621_v19 = vsel %vm618_vm1, %v619_v12, %v620_v13  ;;  %v511_v22 = vrot.slane %v509_v17, 1  ;;  %v622_v33 = vrot.slane %v1111_v28, 1  ;;  %v518_v34 = vshrl.u32 %v1110_v8, 16  ;;  %v1085_v1 = vld [vmem:[%s283_s19] sm:$0xff]   ;;  %v700_v7 = vld [vmem:[%s1396_s3 + $0x28] sm:$0xff] }
  0x15   : > { %v353_v20 = vrot.slane %v351_v14, 1  ;;  %v349_v21 = vor.u32 %v348_v15, %v344_v9  ;;  %1055 = vmatmul.msk.bf16.vlgmr.msra.gmra.mxu3 %vm404_vm0, %v621_v19  ;;  %v522_v35 = vshll.u32 %v1111_v28, 16  ;;  %v361_v37 = vrot.slane %v359_v32, 1 }
  0x16   : > { %v512_v26 = vor.u32 %v511_v22, %v507_v16  ;;  %v623_v38 = vsel %vm618_vm1, %v620_v13, %v622_v33  ;;  %v520_v39 = vor.u32 %v518_v34, %v516_v23  ;;  %v1083_v45 = vunpack.c.h.b16 %v1090_v41  ;;  %v703_v16 = vld [vmem:[%s1396_s3 + $0x40] sm:$0xff] }
  0x17   : > { %v354_v25 = vsel %vm342_vm2, %v349_v21, %v353_v20  ;;  %v357_v36 = vor.u32 %v355_v31, %v353_v20  ;;  %v524_v40 = vrot.slane %v522_v35, 1  ;;  %v336_v46 = vunpack.c.l.b16 %v314_v42 }
  0x18   : > { %711 = vperm.xlu0 %1141, %v696_v24   ;;  %1024 = vmatmul.msk.bf16.vlgmr.msra.gmra.mxu0 %vm404_vm0, %v354_v25  ;;  %v517_v27 = vsel %vm342_vm2, %v512_v26, %v516_v23  ;;  %v363_v49 = vshrl.u32 %v1089_v29, 16  ;;  %v367_v50 = vshll.u32 %v1090_v41, 16  ;;  %v526_v52 = vshrl.u32 %v1111_v28, 16 }
  0x19   : > { %1044 = vmatmul.msk.bf16.vlgmr.msra.gmra.mxu2 %vm404_vm0, %v517_v27  ;;  %v362_v43 = vsel %vm342_vm2, %v357_v36, %v361_v37  ;;  %721 = vperm.xlu1 %1142, %v698_v44   ;;  %v525_v47 = vsel %vm342_vm2, %v520_v39, %v524_v40  ;;  %v505_v48 = vpack.c.b16 %v336_v46, %v1083_v45  ;;  %v371_v2 = vshrl.u32 %v1090_v41, 16 }
  0x1a   : > { %v365_v54 = vor.u32 %v363_v49, %v361_v37  ;;  %v369_v55 = vrot.slane %v367_v50, 1  ;;  %v528_v57 = vor.u32 %v526_v52, %v524_v40  ;;  %v341_v62 = vpack.c.b16 %v336_v46, %v336_v46  ;;  %731 = vperm.xlu2 %1143, %v700_v7  }
  0x1b   : > { %v624_v51 = vrot.slane %v505_v48, 1  ;;  %v530_v53 = vshll.u32 %v505_v48, 16  ;;  %v626_v4 = vrot.slane %v1085_v1, 1  ;;  %v534_v5 = vshrl.u32 %v505_v48, 16 }
  0x1c   : > { %v370_v59 = vsel %vm342_vm2, %v365_v54, %v369_v55  ;;  %v375_v3 = vshll.u32 %v341_v62, 16  ;;  %v542_v6 = vshll.u32 %v1085_v1, 16  ;;  %v373_v8 = vor.u32 %v371_v2, %v369_v55 }
  0x1d   : > { %v625_v56 = vsel %vm618_vm1, %v622_v33, %v624_v51  ;;  %v532_v58 = vrot.slane %v530_v53, 1  ;;  %v630_v10 = vsel %vm618_vm1, %v624_v51, %v626_v4  ;;  %v1086_v14 = vunpack.c.l.b16 %v1085_v1 }
  0x1e   : > { %v377_v9 = vrot.slane %v375_v3, 1  ;;  %v544_v12 = vrot.slane %v542_v6, 1  ;;  %v379_v18 = vshrl.u32 %v341_v62, 16  ;;  %v545_v22 = vshrl.u32 %v1085_v1, 16 }
  0x1f   : > { %v533_v60 = vsel %vm342_vm2, %v528_v57, %v532_v58  ;;  %v385_v17 = vpack.c.b16 %v1086_v14, %v1086_v14  ;;  %v1171_v1 = vmov 0.0  }
  0x20   : > { %736 = vperm.xlu0 %1141, %v701_v61   ;;  %v378_v13 = vsel %vm342_vm2, %v373_v8, %v377_v9  ;;  %v381_v20 = vor.u32 %v379_v18, %v377_v9  ;;  %v547_v24 = vor.u32 %v545_v22, %v544_v12  ;;  %304 = vst.msk [vmem:[#allocation2] sm:$0x1] %vm303_vm9, %v1171_v1 }
  0x21   : > { %1034 = vmatmul.msk.bf16.gmra.mxu1 %vm404_vm0, %v1088_v11  ;;  %741 = vperm.xlu1 %1142, %v702_v63   ;;  %v536_v11 = vor.u32 %v534_v5, %v532_v58  ;;  %v387_v19 = vshll.u32 %v385_v17, 16  ;;  %305 = vst.msk [vmem:[#allocation3] sm:$0x1] %vm303_vm9, %v1171_v1 }
  0x22   : > { %746 = vperm.xlu2 %1143, %v703_v16  }
  0x23   : > { %v551_v15 = vsel %vm550_vm4, %v536_v11, %v544_v12  ;;  %v389_v21 = vrot.slane %v387_v19, 5 }
  0x25   : > { %1056 = vmatmul.msk.bf16.gmra.mxu3 %vm404_vm0, %v623_v38  ;;  %v394_v23 = vsel %vm393_vm7, %v381_v20, %v389_v21 }
  0x28   : > { %1025 = vmatmul.msk.bf16.gmra.mxu0 %vm404_vm0, %v362_v43 }
  0x29   : > { %1045 = vmatmul.msk.bf16.gmra.mxu2 %vm404_vm0, %v525_v47 }
  0x31   : > { %1035 = vmatmul.msk.bf16.gmra.mxu1 %vm404_vm0, %v1089_v29 }
  0x35   : > { %1057 = vmatmul.msk.bf16.gmra.mxu3 %vm404_vm0, %v625_v56 }
  0x38   : > { %1026 = vmatmul.msk.bf16.gmra.mxu0 %vm404_vm0, %v370_v59 }
  0x39   : > { %1046 = vmatmul.msk.bf16.gmra.mxu2 %vm404_vm0, %v533_v60 }
  0x41   : > { %1036 = vmatmul.msk.bf16.gmra.mxu1 %vm404_vm0, %v1090_v41 }
  0x45   : > { %1058 = vmatmul.msk.bf16.gmra.mxu3 %vm404_vm0, %v630_v10 }
  0x48   : > { %1027 = vmatmul.msk.bf16.gmra.mxu0 %vm404_vm0, %v378_v13 }
  0x49   : > { %1047 = vmatmul.msk.bf16.gmra.mxu2 %vm404_vm0, %v551_v15 }
  0x51   : > { %1037 = vmatmul.msk.bf16.gmra.mxu1 %vm404_vm0, %v341_v62 }
  0x55   : > { %1059 = vmatmul.msk.bf16.gmra.mxu3 %vm404_vm0, %v626_v4 }
  0x58   : > { %1028 = vmatmul.msk.bf16.gmra.mxu0 %vm404_vm0, %v394_v23 }
  0x59   : > { %1048 = vmatmul.msk.bf16.gmra.mxu2 %vm404_vm0, %v547_v24 }
  0x6c   : > { %v727_v10 = vpop.permute.xlu2 %726 }
  0x82   : > { %v707_v0 = vpop.permute.xlu0 %706 }
  0x83   : > { %v717_v2 = vpop.permute.xlu1 %716 }
  0x8a   : > { %v712_v12 = vpop.permute.xlu0 %711 }
  0x8b   : > { %v722_v16 = vpop.permute.xlu1 %721 }
  0x8e   : > { %v478_v25 = vpop.f32.mrf.mxu1 }
  0x95   : > { %v429_v26 = vpop.f32.mrf.mxu0 }
  0x96   : > { %v480_v27 = vpop.f32.mrf.mxu1  ;;  %v479_v29 = vadd.f32 %v478_v25, %v429_v26 }
  0x98   : > { %v662_v28 = vpop.f32.mrf.mxu3 }
  0x9c   : > { %v585_v31 = vpop.f32.mrf.mxu2 }
  0x9d   : > { %v431_v30 = vpop.f32.mrf.mxu0  ;;  %v609_v32 = vadd.f32 %v585_v31, %v479_v29 }
  0x9e   : > { %v483_v33 = vpop.f32.mrf.mxu1  ;;  %v481_v36 = vadd.f32 %v480_v27, %v431_v30  ;;  %v732_v27 = vpop.permute.xlu2 %731 }
  0x9f   : > { %v1312_v34 = vadd.f32 %v662_v28, %v609_v32 }
  0xa0   : > { %v664_v35 = vpop.f32.mrf.mxu3 }
  0xa1   : > { %823 = vst.msk [vmem:[%s1310_s7] sm:$0xff] %vm759_vm8, %v1312_v34  ;;  %v749_v19 = vmul.f32 %v707_v0, %v1312_v34 }
  0xa3   : > { %v787_v25 = vmul.f32 %v749_v19, %v1312_v34  ;;  %v760_v31 = vsel %vm759_vm8, %v749_v19, 0.0 }
  0xa4   : > { %v587_v38 = vpop.f32.mrf.mxu2 }
  0xa5   : > { %v434_v37 = vpop.f32.mrf.mxu0  ;;  %v610_v39 = vadd.f32 %v587_v38, %v481_v36  ;;  %v796_v34 = vsel %vm759_vm8, %v787_v25, 0.0 }
  0xa6   : > { %v485_v40 = vpop.f32.mrf.mxu1  ;;  %v484_v43 = vadd.f32 %v483_v33, %v434_v37 }
  0xa7   : > { %v687_v41 = vadd.f32 %v664_v35, %v610_v39 }
  0xa8   : > { %v667_v42 = vpop.f32.mrf.mxu3 }
  0xa9   : > { %824 = vst.msk [vmem:[%s1310_s7 + $0x8] sm:$0xff] %vm759_vm8, %v687_v41  ;;  %v750_v15 = vmul.f32 %v712_v12, %v687_v41 }
  0xab   : > { %v788_v24 = vmul.f32 %v750_v15, %v687_v41  ;;  %v761_v28 = vsel %vm759_vm8, %v750_v15, 0.0 }
  0xac   : > { %v590_v45 = vpop.f32.mrf.mxu2  ;;  %v762_v41 = vadd.f32 %v761_v28, %v760_v31 }
  0xad   : > { %v436_v44 = vpop.f32.mrf.mxu0  ;;  %v611_v46 = vadd.f32 %v590_v45, %v484_v43  ;;  %v797_v36 = vsel %vm759_vm8, %v788_v24, 0.0  ;;  %v737_v43 = vpop.permute.xlu0 %736 }
  0xae   : > { %v488_v47 = vpop.f32.mrf.mxu1  ;;  %v486_v50 = vadd.f32 %v485_v40, %v436_v44 }
  0xaf   : > { %v688_v48 = vadd.f32 %v667_v42, %v611_v46 }
  0xb0   : > { %v669_v49 = vpop.f32.mrf.mxu3 }
  0xb1   : > { %825 = vst.msk [vmem:[%s1310_s7 + $0x10] sm:$0xff] %vm759_vm8, %v688_v48  ;;  %v751_v20 = vmul.f32 %v717_v2, %v688_v48 }
  0xb3   : > { %v789_v26 = vmul.f32 %v751_v20, %v688_v48  ;;  %v763_v37 = vsel %vm759_vm8, %v751_v20, 0.0 }
  0xb4   : > { %v592_v52 = vpop.f32.mrf.mxu2 }
  0xb5   : > { %v439_v51 = vpop.f32.mrf.mxu0  ;;  %v612_v53 = vadd.f32 %v592_v52, %v486_v50  ;;  %v799_v42 = vsel %vm759_vm8, %v789_v26, 0.0  ;;  %v764_v50 = vadd.f32 %v763_v37, %v762_v41  ;;  %v742_v52 = vpop.permute.xlu1 %741 }
  0xb6   : > { %v490_v54 = vpop.f32.mrf.mxu1  ;;  %v489_v57 = vadd.f32 %v488_v47, %v439_v51 }
  0xb7   : > { %v689_v55 = vadd.f32 %v669_v49, %v612_v53  ;;  %v798_v49 = vadd.f32 %v797_v36, %v796_v34  ;;  %v758_v36 = vld [vmem:[#allocation2] sm:$0x1] }
  0xb8   : > { %v672_v56 = vpop.f32.mrf.mxu3 }
  0xb9   : > { %826 = vst.msk [vmem:[%s1310_s7 + $0x18] sm:$0xff] %vm759_vm8, %v689_v55  ;;  %v752_v23 = vmul.f32 %v722_v16, %v689_v55 }
  0xbb   : > { %v790_v32 = vmul.f32 %v752_v23, %v689_v55  ;;  %v765_v44 = vsel %vm759_vm8, %v752_v23, 0.0 }
  0xbc   : > { %v595_v59 = vpop.f32.mrf.mxu2 }
  0xbd   : > { %v441_v58 = vpop.f32.mrf.mxu0  ;;  %v613_v60 = vadd.f32 %v595_v59, %v489_v57  ;;  %v801_v51 = vsel %vm759_vm8, %v790_v32, 0.0  ;;  %v800_v57 = vadd.f32 %v799_v42, %v798_v49 }
  0xbe   : > { %v493_v61 = vpop.f32.mrf.mxu1  ;;  %v491_v3 = vadd.f32 %v490_v54, %v441_v58  ;;  %v766_v58 = vadd.f32 %v765_v44, %v764_v50 }
  0xbf   : > { %v690_v62 = vadd.f32 %v672_v56, %v613_v60 }
  0xc0   : > { %v674_v63 = vpop.f32.mrf.mxu3 }
  0xc1   : > { %827 = vst.msk [vmem:[%s1310_s7 + $0x20] sm:$0xff] %vm759_vm8, %v690_v62  ;;  %v753_v29 = vmul.f32 %v727_v10, %v690_v62 }
  0xc3   : > { %v791_v45 = vmul.f32 %v753_v29, %v690_v62  ;;  %v767_v53 = vsel %vm759_vm8, %v753_v29, 0.0  ;;  %v802_v62 = vadd.f32 %v801_v51, %v800_v57  ;;  %v853_v57 = vld [vmem:[%s1310_s7] sm:$0xff] }
  0xc4   : > { %v597_v5 = vpop.f32.mrf.mxu2 }
  0xc5   : > { %v444_v4 = vpop.f32.mrf.mxu0  ;;  %v614_v6 = vadd.f32 %v597_v5, %v491_v3  ;;  %v803_v59 = vsel %vm759_vm8, %v791_v45, 0.0 }
  0xc6   : > { %v495_v7 = vpop.f32.mrf.mxu1  ;;  %v494_v11 = vadd.f32 %v493_v61, %v444_v4 }
  0xc7   : > { %v691_v8 = vadd.f32 %v674_v63, %v614_v6  ;;  %v768_v63 = vadd.f32 %v767_v53, %v766_v58  ;;  %v804_v6 = vadd.f32 %v803_v59, %v802_v62  ;;  %v854_v58 = vld [vmem:[%s1310_s7 + $0x8] sm:$0xff]  ;;  %v855_v59 = vld [vmem:[%s1310_s7 + $0x10] sm:$0xff] }
  0xc8   : > { %v677_v9 = vpop.f32.mrf.mxu3 }
  0xc9   : > { %828 = vst.msk [vmem:[%s1310_s7 + $0x28] sm:$0xff] %vm759_vm8, %v691_v8  ;;  %v754_v38 = vmul.f32 %v732_v27, %v691_v8 }
  0xcb   : > { %v792_v54 = vmul.f32 %v754_v38, %v691_v8  ;;  %v769_v60 = vsel %vm759_vm8, %v754_v38, 0.0 }
  0xcc   : > { %v600_v14 = vpop.f32.mrf.mxu2 }
  0xcd   : > { %v446_v13 = vpop.f32.mrf.mxu0  ;;  %v615_v17 = vadd.f32 %v600_v14, %v494_v11  ;;  %v805_v2 = vsel %vm759_vm8, %v792_v54, 0.0  ;;  %v747_v14 = vpop.permute.xlu2 %746 }
  0xce   : > { %v498_v18 = vpop.f32.mrf.mxu1  ;;  %v496_v30 = vadd.f32 %v495_v7, %v446_v13  ;;  %v770_v7 = vadd.f32 %v769_v60, %v768_v63  ;;  %v806_v12 = vadd.f32 %v805_v2, %v804_v6  ;;  %v856_v60 = vld [vmem:[%s1310_s7 + $0x18] sm:$0xff]  ;;  %v857_v63 = vld [vmem:[%s1310_s7 + $0x20] sm:$0xff] }
  0xcf   : > { %v692_v21 = vadd.f32 %v677_v9, %v615_v17 }
  0xd0   : > { %v679_v22 = vpop.f32.mrf.mxu3 }
  0xd1   : > { %829 = vst.msk [vmem:[%s1310_s7 + $0x30] sm:$0xff] %vm759_vm8, %v692_v21  ;;  %v755_v46 = vmul.f32 %v737_v43, %v692_v21 }
  0xd3   : > { %v793_v61 = vmul.f32 %v755_v46, %v692_v21  ;;  %v771_v3 = vsel %vm759_vm8, %v755_v46, 0.0 }
  0xd4   : > { %v602_v35 = vpop.f32.mrf.mxu2  ;;  %v772_v13 = vadd.f32 %v771_v3, %v770_v7 }
  0xd5   : > { %v449_v33 = vpop.f32.mrf.mxu0  ;;  %v616_v39 = vadd.f32 %v602_v35, %v496_v30  ;;  %v807_v8 = vsel %vm759_vm8, %v793_v61, 0.0 }
  0xd6   : > { %v500_v40 = vpop.f32.mrf.mxu1  ;;  %v499_v55 = vadd.f32 %v498_v18, %v449_v33  ;;  %v808_v17 = vadd.f32 %v807_v8, %v806_v12 }
  0xd7   : > { %v693_v47 = vadd.f32 %v679_v22, %v616_v39  ;;  %v786_v39 = vld [vmem:[#allocation3] sm:$0x1] }
  0xd8   : > { %v682_v48 = vpop.f32.mrf.mxu3 }
  0xd9   : > { %v756_v56 = vmul.f32 %v742_v52, %v693_v47  ;;  %830 = vst.msk [vmem:[%s1310_s7 + $0x38] sm:$0xff] %vm759_vm8, %v693_v47 }
  0xdb   : > { %v794_v4 = vmul.f32 %v756_v56, %v693_v47  ;;  %v773_v9 = vsel %vm759_vm8, %v756_v56, 0.0 }
  0xdc   : > { %v605_v1 = vpop.f32.mrf.mxu2  ;;  %v774_v18 = vadd.f32 %v773_v9, %v772_v13 }
  0xdd   : > { %v451_v0 = vpop.f32.mrf.mxu0  ;;  %v617_v5 = vadd.f32 %v605_v1, %v499_v55  ;;  %v809_v15 = vsel %vm759_vm8, %v794_v4, 0.0  ;;  %v859_v1 = vld [vmem:[%s1310_s7 + $0x30] sm:$0xff] }
  0xde   : > { %v810_v21 = vadd.f32 %v809_v15, %v808_v17  ;;  %v858_v0 = vld [vmem:[%s1310_s7 + $0x28] sm:$0xff] }
  0xdf   : > { %v694_v10 = vadd.f32 %v682_v48, %v617_v5 }
  0xe0   : > { %v684_v11 = vpop.f32.mrf.mxu3  ;;  %v860_v9 = vld [vmem:[%s1310_s7 + $0x38] sm:$0xff] }
  0xe1   : > { %v757_v16 = vmul.f32 %v747_v14, %v694_v10  ;;  %831 = vst.msk [vmem:[%s1310_s7 + $0x40] sm:$0xff] %vm759_vm8, %v694_v10 }
  0xe3   : > { %v775_v19 = vsel %vm759_vm8, %v757_v16, 0.0  ;;  %v795_v20 = vmul.f32 %v757_v16, %v694_v10 }
  0xe4   : > { %v776_v22 = vadd.f32 %v775_v19, %v774_v18  ;;  %v607_v23 = vpop.f32.mrf.mxu2 }
  0xe5   : > { %v811_v24 = vsel %vm759_vm8, %v795_v20, 0.0 }
  0xe6   : > { %v777_v25 = vrot.slane %v776_v22, 4  ;;  %v812_v26 = vadd.f32 %v811_v24, %v810_v21 }
  0xe8   : > { %v778_v27 = vadd.f32 %v777_v25, %v776_v22  ;;  %v813_v28 = vrot.slane %v812_v26, 4  ;;  %v861_v10 = vld [vmem:[%s1310_s7 + $0x40] sm:$0xff] }
  0xea   : > { %v779_v29 = vrot.slane %v778_v27, 2  ;;  %v814_v30 = vadd.f32 %v813_v28, %v812_v26 }
  0xec   : > { %v780_v31 = vadd.f32 %v779_v29, %v778_v27  ;;  %v815_v32 = vrot.slane %v814_v30, 2 }
  0xee   : > { %v781_v33 = vrot.slane %v780_v31, 1  ;;  %v816_v35 = vadd.f32 %v815_v32, %v814_v30 }
  0xf0   : > { %v782_v37 = vadd.f32 %v781_v33, %v780_v31  ;;  %v817_v38 = vrot.slane %v816_v35, 1 }
  0xf2   : > { %v783_v40 = vadd.f32 %v782_v37, %v758_v36  ;;  %v818_v34 = vadd.f32 %v817_v38, %v816_v35 }
  0xf4   : > { %785 = vst.msk [vmem:[#allocation2] sm:$0x1] %vm303_vm9, %v783_v40  ;;  %v819_v41 = vadd.f32 %v818_v34, %v786_v39 }
  0xf6   : > { %820 = vst.msk [vmem:[#allocation3] sm:$0x1] %vm303_vm9, %v819_v41 }
  0xfb   : > { %v835_v42 = vld [vmem:[#allocation2] sm:$0x1] }
  0xfc   : > { %v836_v43 = vmul.f32 0.015625, %v835_v42 }
  0xfd   : > { %v837_v44 = vld [vmem:[#allocation3] sm:$0x1] }
  0xfe   : > { %v838_v45 = vmul.f32 0.015625, %v837_v44  ;;  %v839_v46 = vmul.f32 %v836_v43, %v836_v43  ;;  %v863_v55 = vperm.slane %v836_v43, 0 }
 0x100   : > { %v840_v47 = vsub.f32 %v838_v45, %v839_v46  ;;  %v865_v62 = vsub.f32 %v853_v57, %v863_v55  ;;  %v866_v2 = vsub.f32 %v854_v58, %v863_v55  ;;  %v867_v3 = vsub.f32 %v855_v59, %v863_v55 }
 0x101   : > { %v868_v4 = vsub.f32 %v856_v60, %v863_v55  ;;  %v869_v6 = vsub.f32 %v857_v63, %v863_v55  ;;  %v870_v7 = vsub.f32 %v858_v0, %v863_v55  ;;  %v871_v8 = vsub.f32 %v859_v1, %v863_v55 }
 0x102   : > { %v841_v48 = vmax.f32 %v840_v47, 0.0  ;;  %v872_v15 = vsub.f32 %v860_v9, %v863_v55  ;;  %v873_v16 = vsub.f32 %v861_v10, %v863_v55 }
 0x104   : > { %v842_v49 = vadd.f32 1e-05, %v841_v48 }
 0x106   : > { %1144 = vrsqrt.f32 %v842_v49  ;;  %vm849_vm11 = vweird.f32 %v842_v49 }
 0x10c   : > { %v1145_v50 = vpop.eup %1144 }
 0x10d   : > { %v844_v51 = vmul.f32 %v1145_v50, %v842_v49  ;;  %vm850_vm10 = vweird.f32 %v1145_v50 }
 0x10e   : > { %vm851_vm12 = vmor %vm849_vm11, %vm850_vm10 }
 0x10f   : > { %v845_v52 = vmul.f32 %v1145_v50, %v844_v51 }
 0x111   : > { %v846_v53 = vmul.f32 0.5, %v845_v52 }
 0x113   : > { %v847_v54 = vsub.f32 1.5, %v846_v53 }
 0x115   : > { %v848_v56 = vmul.f32 %v1145_v50, %v847_v54 }
 0x117   : > { %v852_v61 = vsel %vm851_vm12, %v1145_v50, %v848_v56 }
 0x118   : > { %v875_v5 = vperm.slane %v852_v61, 0 }
 0x11a   : > { %v877_v11 = vmul.f32 %v875_v5, %v865_v62  ;;  %v878_v12 = vmul.f32 %v875_v5, %v866_v2  ;;  %v879_v13 = vmul.f32 %v875_v5, %v867_v3  ;;  %v880_v14 = vmul.f32 %v875_v5, %v868_v4 }
 0x11b   : > { %v881_v17 = vmul.f32 %v875_v5, %v869_v6  ;;  %v882_v18 = vmul.f32 %v875_v5, %v870_v7  ;;  %v883_v19 = vmul.f32 %v875_v5, %v871_v8  ;;  %v884_v23 = vmul.f32 %v875_v5, %v872_v15 }
 0x11c   : > { %v886_v20 = vmax.f32 %v877_v11, 0.0  ;;  %v887_v21 = vmax.f32 %v878_v12, 0.0  ;;  %v888_v22 = vmax.f32 %v879_v13, 0.0  ;;  %v889_v24 = vmax.f32 %v880_v14, 0.0 }
 0x11d   : > { %v885_v25 = vmul.f32 %v875_v5, %v873_v16  ;;  %v890_v26 = vmax.f32 %v881_v17, 0.0  ;;  %v891_v27 = vmax.f32 %v882_v18, 0.0  ;;  %v892_v28 = vmax.f32 %v883_v19, 0.0 }
 0x11e   : > { %895 = vst.msk [vmem:[%s1310_s7] sm:$0xff] %vm759_vm8, %v886_v20  ;;  %v893_v29 = vmax.f32 %v884_v23, 0.0 }
 0x11f   : > { %896 = vst.msk [vmem:[%s1310_s7 + $0x8] sm:$0xff] %vm759_vm8, %v887_v21  ;;  %v894_v30 = vmax.f32 %v885_v25, 0.0 }
 0x120   : > { %897 = vst.msk [vmem:[%s1310_s7 + $0x10] sm:$0xff] %vm759_vm8, %v888_v22 }
 0x121   : > { %898 = vst.msk [vmem:[%s1310_s7 + $0x18] sm:$0xff] %vm759_vm8, %v889_v24 }
 0x122   : > { %899 = vst.msk [vmem:[%s1310_s7 + $0x20] sm:$0xff] %vm759_vm8, %v890_v26 }
 0x123   : > { %900 = vst.msk [vmem:[%s1310_s7 + $0x28] sm:$0xff] %vm759_vm8, %v891_v27 }
 0x124   : > { %901 = vst.msk [vmem:[%s1310_s7 + $0x30] sm:$0xff] %vm759_vm8, %v892_v28 }
 0x125   : > { %902 = vst.msk [vmem:[%s1310_s7 + $0x38] sm:$0xff] %vm759_vm8, %v893_v29 }
 0x126   : > { %903 = vst.msk [vmem:[%s1310_s7 + $0x40] sm:$0xff] %vm759_vm8, %v894_v30 }
 0x127 PF: > { %s14_s17 = sadd.s32 1, %s1168_s17   ;;  %s1398_s15 = smov %s1164_s16 }
 0x128   : > { %p11_p5 = scmp.ge.s32.totalorder %s14_s17, 4   ;;  %s1399_s16 = smov %s1401_s18 }
 0x12a   :  { %13 = sbr.rel (!%p11_p5) target bundleno = 2 (0x2), region = 84 }

</bundles_post_ra>
